<compile_context>
chip_gen: v6e
topology: v6e:2x2x1
jax: 0.10.0
libtpu: 0.0.40
codegen_flags: <defaults>
</compile_context>

<pallas_src>
import math

import jax
import jax.numpy as jnp
from jax.experimental import pallas as pl
from jax.experimental.pallas import tpu as pltpu

VMEM_SPEC = pl.BlockSpec(memory_space=pltpu.MemorySpace.VMEM)
BN_EPS = 1e-5


# ---------------------------------------------------------------------------
# Host-side constant matrices (tiny, passed as VMEM inputs)
# ---------------------------------------------------------------------------
def _make_pool_select(n_batch, l_conv):
    """Block-diagonal 0/1 matrix (N*l_conv - 2, N*l_pool).

    Column (n, p) picks row n*l_conv + 3*p, i.e. applied to the batched
    sliding-window-max it implements MaxPool1d(k=3, stride=3) per sample
    without ever selecting a window that crosses a sample boundary.
    """
    l_pool = l_conv // 3
    rows, cols = n_batch * l_conv - 2, n_batch * l_pool
    r = jax.lax.broadcasted_iota(jnp.int32, (rows, cols), 0)
    c = jax.lax.broadcasted_iota(jnp.int32, (rows, cols), 1)
    target = (c // l_pool) * l_conv + 3 * (c % l_pool)
    return jnp.where(r == target, 1.0, 0.0).astype(jnp.float32)


def _make_group_sum(n_batch, l_final):
    """(N*l_final, N) 0/1 matrix summing each sample's l_final lanes."""
    r = jax.lax.broadcasted_iota(jnp.int32, (n_batch * l_final, n_batch), 0)
    c = jax.lax.broadcasted_iota(jnp.int32, (n_batch * l_final, n_batch), 1)
    return jnp.where(r // l_final == c, 1.0, 0.0).astype(jnp.float32)


# ---------------------------------------------------------------------------
# Fused kernel
# ---------------------------------------------------------------------------
def _make_fused_kernel(n_blocks, n_batch, seq_len):
    """Whole CNN1d forward in one kernel, batched along the lane axis.

    Inputs (all VMEM):
      x:               (1, N*L)          samples concatenated along lanes
      w_i:             (Cout, K*Cin)     BN/Normalization-folded conv weights
      s_i:             (Cout, 1)         folded conv-bias/BN shift
      sel_i:           (N*l_conv-2, N*l_pool)  stride-3 block-diag select
      w_head:          (C_last, 1)       (w2 @ w1 / L_final).T  (Dropout=eval)
      b_head:          (1, 1)            w2 @ b1 + b2
      grp:             (N*L_final, N)    per-sample lane group-sum
    Output: o (1, N)  -- single store; wrapper transposes to (N, 1).
    """

    def kernel(*refs):
        x_ref = refs[0]
        w_refs = refs[1:1 + n_blocks]
        s_refs = refs[1 + n_blocks:1 + 2 * n_blocks]
        sel_refs = refs[1 + 2 * n_blocks:1 + 3 * n_blocks]
        wh_ref, bh_ref, grp_ref, o_ref = refs[1 + 3 * n_blocks:]

        a = x_ref[...]                       # (1, N*L): channels x (batched) length
        l_in = seq_len                       # per-sample length at current stage
        for b in range(n_blocks):
            w = w_refs[b][...]               # loaded exactly once per layer
            s = s_refs[b][...]
            sel = sel_refs[b][...]
            c_in = a.shape[0]
            l_conv = l_in - 2                # Conv1d(k=3, stride=1, no padding)
            if c_in == 1:
                # Layer 0 (mono input): conv on the VPU as 3 shifted
                # multiply-adds over all samples at once (no MXU latency).
                taps = [
                    jnp.concatenate(
                        [a[:, n * l_in + k:n * l_in + k + l_conv]
                         for n in range(n_batch)], axis=1)
                    for k in range(3)
                ]
                y = (w[:, 0:1] * taps[0] + w[:, 1:2] * taps[1]
                     + w[:, 2:3] * taps[2]) + s
            else:
                # Batched im2col: K=3 taps stacked on sublanes (c_in rows per
                # tap, c_in % 8 == 0 so aligned), samples concatenated along
                # lanes -> ONE lane-dense MXU matmul for the whole batch.
                rows = jnp.concatenate(
                    [jnp.concatenate(
                        [a[:, n * l_in + k:n * l_in + k + l_conv]
                         for k in range(3)], axis=0)
                     for n in range(n_batch)], axis=1)
                y = jnp.dot(w, rows, preferred_element_type=jnp.float32) + s
            # MaxPool1d(k=3, stride=3) + ReLU, stride-free and batched:
            # sliding-window max over 3 unit-stride lane shifts (VPU), then the
            # block-diagonal 0/1 select matmul keeps only in-sample windows.
            width = n_batch * l_conv
            z = jnp.maximum(
                jnp.maximum(y[:, 0:width - 2], y[:, 1:width - 1]),
                y[:, 2:width])
            a = jnp.maximum(
                jnp.dot(z, sel, preferred_element_type=jnp.float32), 0.0)
            l_in = l_conv // 3

        # Folded head: AdaptiveAvgPool1d(1) + Flatten + Linear + Dropout(eval)
        # + Linear collapse to  out_n = w_head . sum_p a[:, n, p] + b_head.
        t = jnp.sum(wh_ref[...] * a, axis=0, keepdims=True)      # (1, N*l_final)
        out = jnp.dot(t, grp_ref[...],
                      preferred_element_type=jnp.float32) + bh_ref[...]  # (1, N)
        o_ref[...] = out                    # single lane-major store

    return kernel


# ---------------------------------------------------------------------------
# Wrapper
# ---------------------------------------------------------------------------
def cnn1d_forward(x_ncl, params):
    """x_ncl: (N, 1, L) PyTorch NCL input. Returns (N, 1)."""
    n, _, seq_len = x_ncl.shape
    n_blocks = len(params["blocks"])
    # Samples concatenated along lanes (Cin == 1, so this is just a reshape).
    x_flat = x_ncl.astype(jnp.float32).reshape(1, n * seq_len)
    args = [x_flat]
    args += [blk["w"] for blk in params["blocks"]]
    args += [blk["shift"] for blk in params["blocks"]]
    args += list(params["sels"])
    args += [params["w_head_col"], params["b_head"], params["grp"]]
    # Gridless single call: at N=2 this minimizes per-step overhead (single TC
    # on v5e/v6e). For realistic batches on v7x, switch to grid=(cdiv(N,Tn),)
    # over batch with dimension_semantics=("parallel",) to use both TCs.
    out = pl.pallas_call(
        _make_fused_kernel(n_blocks, n, seq_len),
        out_shape=jax.ShapeDtypeStruct((1, n), jnp.float32),
        in_specs=[VMEM_SPEC] * len(args),
        out_specs=VMEM_SPEC,
    )(*args)
    return out.T                            # (N, 1): PyTorch output layout


# ---------------------------------------------------------------------------
# Deterministic parameter construction (shapes follow CNN1d.__init__).
# All affine pieces that commute with the convolutions are folded HERE, once:
#   * conv bias + BatchNorm1d (eval running stats) -> (w_eff, shift_eff)
#   * input Normalization ((x - mean)/std)         -> folded into block 0
#   * AdaptiveAvgPool1d(1)'s 1/L_final, Dropout(eval)=identity,
#     Linear(h_last,128) and Linear(128,1)         -> single (C_last,) head
# ---------------------------------------------------------------------------
def init_params(key, hidden_sizes, seq_len, n_batch, norm_mean, norm_std,
                width=128):
    blocks, sels = [], []
    c_in, l_cur = 1, seq_len
    for i, h in enumerate(hidden_sizes):
        key, k1, k2 = jax.random.split(key, 3)
        bound = 1.0 / math.sqrt(c_in * 3)
        w = jax.random.uniform(k1, (h, c_in, 3), jnp.float32, -bound, bound)
        b = jax.random.uniform(k2, (h,), jnp.float32, -bound, bound)
        # Fresh BatchNorm1d (eval): gamma=1, beta=0, running_mean=0, running_var=1.
        gamma = jnp.ones((h,), jnp.float32)
        beta = jnp.zeros((h,), jnp.float32)
        r_mean = jnp.zeros((h,), jnp.float32)
        r_var = jnp.ones((h,), jnp.float32)
        scale = gamma / jnp.sqrt(r_var + BN_EPS)
        w_bn = w * scale[:, None, None]
        shift = (b - r_mean) * scale + beta
        if i == 0:
            # Fold the input Normalization into the first conv (exact algebra).
            shift = shift - (norm_mean / norm_std) * jnp.sum(w_bn, axis=(1, 2))
            w_bn = w_bn / norm_std
            w_kern = w_bn[:, 0, :]                               # (h, K)
        else:
            # im2col layout: column index = k * c_in + ci.
            w_kern = jnp.transpose(w_bn, (0, 2, 1)).reshape(h, 3 * c_in)
        l_conv = l_cur - 2
        sels.append(_make_pool_select(n_batch, l_conv))
        blocks.append(dict(w=w_kern, shift=shift.reshape(h, 1)))
        c_in, l_cur = h, l_conv // 3

    key, k1, k2, k3, k4 = jax.random.split(key, 5)
    lim1 = 1.0 / math.sqrt(c_in)
    w1 = jax.random.uniform(k1, (width, c_in), jnp.float32, -lim1, lim1)
    b1 = jax.random.uniform(k2, (width, 1), jnp.float32, -lim1, lim1)
    lim2 = 1.0 / math.sqrt(width)
    w2 = jax.random.uniform(k3, (1, width), jnp.float32, -lim2, lim2)
    b2 = jax.random.uniform(k4, (1, 1), jnp.float32, -lim2, lim2)
    # Fold Linear-Dropout(eval)-Linear + AdaptiveAvgPool's 1/L into one vector.
    w_head = (w2 @ w1) / float(l_cur)                            # (1, C_last)
    b_head = w2 @ b1 + b2                                        # (1, 1)
    return dict(blocks=blocks, sels=sels,
                w_head_col=w_head.T, b_head=b_head,
                grp=_make_group_sum(n_batch, l_cur))


# ---------------------------------------------------------------------------
# Pure-JAX per-sample reference (same folded params, unbatched structure)
# ---------------------------------------------------------------------------
def _reference_forward(x_ncl, params):
    n = x_ncl.shape[0]
    outs = []
    for i in range(n):
        a = x_ncl[i].astype(jnp.float32)                         # (1, L)
        for blk in params["blocks"]:
            w, s = blk["w"], blk["shift"]
            l_conv = a.shape[1] - 2
            rows = jnp.concatenate([a[:, k:k + l_conv] for k in range(3)],
                                   axis=0)
            y = w @ rows + s
            l_pool = l_conv // 3
            z = jnp.stack([y[:, 3 * p:3 * p + 3].max(axis=1)
                           for p in range(l_pool)], axis=1)
            a = jnp.maximum(z, 0.0)
        g = a.sum(axis=1, keepdims=True)
        out = params["w_head_col"].T @ g + params["b_head"]
        outs.append(out[0, 0])
    return jnp.stack(outs).reshape(n, 1)


if __name__ == "__main__":
    key = jax.random.PRNGKey(0)
    key, kx = jax.random.split(key)

    N, L = 2, 96                       # batch=2, mono audio of length 96
    hidden_sizes = [8, 16]             # CNN1d(hidden_sizes=[8,16], activation=ReLU)
    norm_mean, norm_std = 0.1, 1.5     # stands in for dataset mean/std of Normalization
    # TODO(synk): pad_trunc_audio / dataset-derived mean & std are data-pipeline code,
    # replaced here by fixed-length input and fixed constants.

    x = jax.random.normal(kx, (N, 1, L), jnp.float32)   # PyTorch NCL input layout
    params = init_params(key, hidden_sizes, seq_len=L, n_batch=N,
                         norm_mean=norm_mean, norm_std=norm_std)

    fwd = jax.jit(lambda inp: cnn1d_forward(inp, params))
    out = jax.block_until_ready(fwd(x))
    assert out.shape == (N, 1) and out.dtype == jnp.float32

    ref = jax.block_until_ready(_reference_forward(x, params))
    assert jnp.allclose(out, ref, rtol=1e-3, atol=1e-3), (out, ref)
    print("KERNEL_OK")
</pallas_src>

<mosaic_0001>
module attributes {stable_mosaic.version = 11 : i64} {
  func.func @kernel(%arg0: memref<1x192xf32, #tpu.memory_space<vmem>>, %arg1: memref<8x3xf32, #tpu.memory_space<vmem>>, %arg2: memref<16x24xf32, #tpu.memory_space<vmem>>, %arg3: memref<8x1xf32, #tpu.memory_space<vmem>>, %arg4: memref<16x1xf32, #tpu.memory_space<vmem>>, %arg5: memref<186x62xf32, #tpu.memory_space<vmem>>, %arg6: memref<56x18xf32, #tpu.memory_space<vmem>>, %arg7: memref<16x1xf32, #tpu.memory_space<vmem>>, %arg8: memref<1x1xf32, #tpu.memory_space<vmem>>, %arg9: memref<18x2xf32, #tpu.memory_space<vmem>>, %arg10: memref<1x2xf32, #tpu.memory_space<vmem>>) attributes {dimension_semantics = [], scalar_prefetch = 0 : i64, scratch_operands = 0 : i64, tpu.core_type = #tpu.core_type<tc>} {
    %c0 = arith.constant 0 : index
    %c0_0 = arith.constant 0 : index
    %0 = vector.load %arg0[%c0, %c0_0] : memref<1x192xf32, #tpu.memory_space<vmem>>, vector<1x192xf32>
    %c0_1 = arith.constant 0 : index
    %c0_2 = arith.constant 0 : index
    %1 = vector.load %arg1[%c0_1, %c0_2] : memref<8x3xf32, #tpu.memory_space<vmem>>, vector<8x3xf32>
    %c0_3 = arith.constant 0 : index
    %c0_4 = arith.constant 0 : index
    %2 = vector.load %arg3[%c0_3, %c0_4] : memref<8x1xf32, #tpu.memory_space<vmem>>, vector<8x1xf32>
    %c0_5 = arith.constant 0 : index
    %c0_6 = arith.constant 0 : index
    %3 = vector.load %arg5[%c0_5, %c0_6] : memref<186x62xf32, #tpu.memory_space<vmem>>, vector<186x62xf32>
    %4 = vector.extract_strided_slice %0 {offsets = [0, 0], sizes = [1, 94], strides = [1, 1]} : vector<1x192xf32> to vector<1x94xf32>
    %5 = vector.extract_strided_slice %0 {offsets = [0, 96], sizes = [1, 94], strides = [1, 1]} : vector<1x192xf32> to vector<1x94xf32>
    %6 = tpu.concatenate %4, %5 in 1 : vector<1x94xf32>, vector<1x94xf32> -> vector<1x188xf32>
    %7 = vector.extract_strided_slice %0 {offsets = [0, 1], sizes = [1, 94], strides = [1, 1]} : vector<1x192xf32> to vector<1x94xf32>
    %8 = vector.extract_strided_slice %0 {offsets = [0, 97], sizes = [1, 94], strides = [1, 1]} : vector<1x192xf32> to vector<1x94xf32>
    %9 = tpu.concatenate %7, %8 in 1 : vector<1x94xf32>, vector<1x94xf32> -> vector<1x188xf32>
    %10 = vector.extract_strided_slice %0 {offsets = [0, 2], sizes = [1, 94], strides = [1, 1]} : vector<1x192xf32> to vector<1x94xf32>
    %11 = vector.extract_strided_slice %0 {offsets = [0, 98], sizes = [1, 94], strides = [1, 1]} : vector<1x192xf32> to vector<1x94xf32>
    %12 = tpu.concatenate %10, %11 in 1 : vector<1x94xf32>, vector<1x94xf32> -> vector<1x188xf32>
    %13 = vector.extract_strided_slice %1 {offsets = [0, 0], sizes = [8, 1], strides = [1, 1]} : vector<8x3xf32> to vector<8x1xf32>
    %14 = vector.broadcast %13 : vector<8x1xf32> to vector<8x188xf32>
    %15 = vector.broadcast %6 : vector<1x188xf32> to vector<8x188xf32>
    %16 = arith.mulf %14, %15 : vector<8x188xf32>
    %17 = vector.extract_strided_slice %1 {offsets = [0, 1], sizes = [8, 1], strides = [1, 1]} : vector<8x3xf32> to vector<8x1xf32>
    %18 = vector.broadcast %17 : vector<8x1xf32> to vector<8x188xf32>
    %19 = vector.broadcast %9 : vector<1x188xf32> to vector<8x188xf32>
    %20 = arith.mulf %18, %19 : vector<8x188xf32>
    %21 = arith.addf %16, %20 : vector<8x188xf32>
    %22 = vector.extract_strided_slice %1 {offsets = [0, 2], sizes = [8, 1], strides = [1, 1]} : vector<8x3xf32> to vector<8x1xf32>
    %23 = vector.broadcast %22 : vector<8x1xf32> to vector<8x188xf32>
    %24 = vector.broadcast %12 : vector<1x188xf32> to vector<8x188xf32>
    %25 = arith.mulf %23, %24 : vector<8x188xf32>
    %26 = arith.addf %21, %25 : vector<8x188xf32>
    %27 = vector.broadcast %2 : vector<8x1xf32> to vector<8x188xf32>
    %28 = arith.addf %26, %27 : vector<8x188xf32>
    %29 = vector.extract_strided_slice %28 {offsets = [0, 0], sizes = [8, 186], strides = [1, 1]} : vector<8x188xf32> to vector<8x186xf32>
    %30 = vector.extract_strided_slice %28 {offsets = [0, 1], sizes = [8, 186], strides = [1, 1]} : vector<8x188xf32> to vector<8x186xf32>
    %31 = arith.maximumf %29, %30 : vector<8x186xf32>
    %32 = vector.extract_strided_slice %28 {offsets = [0, 2], sizes = [8, 186], strides = [1, 1]} : vector<8x188xf32> to vector<8x186xf32>
    %33 = arith.maximumf %31, %32 : vector<8x186xf32>
    %cst = arith.constant dense<0.000000e+00> : vector<8x62xf32>
    %34 = tpu.matmul %33, %3, %cst {dimension_numbers = #tpu.dot_dimension_numbers<[1], [0], [0], [1], [0, 0, 1, 1], [], []>} : vector<8x186xf32>, vector<186x62xf32>, vector<8x62xf32> -> vector<8x62xf32>
    %cst_7 = arith.constant 0.000000e+00 : f32
    %35 = vector.broadcast %cst_7 : f32 to vector<8x62xf32>
    %36 = arith.maximumf %34, %35 : vector<8x62xf32>
    %c0_8 = arith.constant 0 : index
    %c0_9 = arith.constant 0 : index
    %37 = vector.load %arg2[%c0_8, %c0_9] : memref<16x24xf32, #tpu.memory_space<vmem>>, vector<16x24xf32>
    %c0_10 = arith.constant 0 : index
    %c0_11 = arith.constant 0 : index
    %38 = vector.load %arg4[%c0_10, %c0_11] : memref<16x1xf32, #tpu.memory_space<vmem>>, vector<16x1xf32>
    %c0_12 = arith.constant 0 : index
    %c0_13 = arith.constant 0 : index
    %39 = vector.load %arg6[%c0_12, %c0_13] : memref<56x18xf32, #tpu.memory_space<vmem>>, vector<56x18xf32>
    %40 = vector.extract_strided_slice %36 {offsets = [0, 0], sizes = [8, 29], strides = [1, 1]} : vector<8x62xf32> to vector<8x29xf32>
    %41 = vector.extract_strided_slice %36 {offsets = [0, 1], sizes = [8, 29], strides = [1, 1]} : vector<8x62xf32> to vector<8x29xf32>
    %42 = vector.extract_strided_slice %36 {offsets = [0, 2], sizes = [8, 29], strides = [1, 1]} : vector<8x62xf32> to vector<8x29xf32>
    %43 = tpu.concatenate %40, %41, %42 in 0 : vector<8x29xf32>, vector<8x29xf32>, vector<8x29xf32> -> vector<24x29xf32>
    %44 = vector.extract_strided_slice %36 {offsets = [0, 31], sizes = [8, 29], strides = [1, 1]} : vector<8x62xf32> to vector<8x29xf32>
    %45 = vector.extract_strided_slice %36 {offsets = [0, 32], sizes = [8, 29], strides = [1, 1]} : vector<8x62xf32> to vector<8x29xf32>
    %46 = vector.extract_strided_slice %36 {offsets = [0, 33], sizes = [8, 29], strides = [1, 1]} : vector<8x62xf32> to vector<8x29xf32>
    %47 = tpu.concatenate %44, %45, %46 in 0 : vector<8x29xf32>, vector<8x29xf32>, vector<8x29xf32> -> vector<24x29xf32>
    %48 = tpu.concatenate %43, %47 in 1 : vector<24x29xf32>, vector<24x29xf32> -> vector<24x58xf32>
    %cst_14 = arith.constant dense<0.000000e+00> : vector<16x58xf32>
    %49 = tpu.matmul %37, %48, %cst_14 {dimension_numbers = #tpu.dot_dimension_numbers<[1], [0], [0], [1], [0, 0, 1, 1], [], []>} : vector<16x24xf32>, vector<24x58xf32>, vector<16x58xf32> -> vector<16x58xf32>
    %50 = vector.broadcast %38 : vector<16x1xf32> to vector<16x58xf32>
    %51 = arith.addf %49, %50 : vector<16x58xf32>
    %52 = vector.extract_strided_slice %51 {offsets = [0, 0], sizes = [16, 56], strides = [1, 1]} : vector<16x58xf32> to vector<16x56xf32>
    %53 = vector.extract_strided_slice %51 {offsets = [0, 1], sizes = [16, 56], strides = [1, 1]} : vector<16x58xf32> to vector<16x56xf32>
    %54 = arith.maximumf %52, %53 : vector<16x56xf32>
    %55 = vector.extract_strided_slice %51 {offsets = [0, 2], sizes = [16, 56], strides = [1, 1]} : vector<16x58xf32> to vector<16x56xf32>
    %56 = arith.maximumf %54, %55 : vector<16x56xf32>
    %cst_15 = arith.constant dense<0.000000e+00> : vector<16x18xf32>
    %57 = tpu.matmul %56, %39, %cst_15 {dimension_numbers = #tpu.dot_dimension_numbers<[1], [0], [0], [1], [0, 0, 1, 1], [], []>} : vector<16x56xf32>, vector<56x18xf32>, vector<16x18xf32> -> vector<16x18xf32>
    %cst_16 = arith.constant 0.000000e+00 : f32
    %58 = vector.broadcast %cst_16 : f32 to vector<16x18xf32>
    %59 = arith.maximumf %57, %58 : vector<16x18xf32>
    %c0_17 = arith.constant 0 : index
    %c0_18 = arith.constant 0 : index
    %60 = vector.load %arg7[%c0_17, %c0_18] : memref<16x1xf32, #tpu.memory_space<vmem>>, vector<16x1xf32>
    %61 = vector.broadcast %60 : vector<16x1xf32> to vector<16x18xf32>
    %62 = arith.mulf %61, %59 : vector<16x18xf32>
    %cst_19 = arith.constant dense<0.000000e+00> : vector<18xf32>
    %63 = vector.multi_reduction <add>, %62, %cst_19 [0] : vector<16x18xf32> to vector<18xf32>
    %64 = vector.shape_cast %63 : vector<18xf32> to vector<1x18xf32>
    %c0_20 = arith.constant 0 : index
    %c0_21 = arith.constant 0 : index
    %65 = vector.load %arg9[%c0_20, %c0_21] : memref<18x2xf32, #tpu.memory_space<vmem>>, vector<18x2xf32>
    %cst_22 = arith.constant dense<0.000000e+00> : vector<1x2xf32>
    %66 = tpu.matmul %64, %65, %cst_22 {dimension_numbers = #tpu.dot_dimension_numbers<[1], [0], [0], [1], [0, 0, 1, 1], [], []>} : vector<1x18xf32>, vector<18x2xf32>, vector<1x2xf32> -> vector<1x2xf32>
    %c0_23 = arith.constant 0 : index
    %c0_24 = arith.constant 0 : index
    %67 = vector.load %arg8[%c0_23, %c0_24] : memref<1x1xf32, #tpu.memory_space<vmem>>, vector<1x1xf32>
    %68 = vector.broadcast %67 : vector<1x1xf32> to vector<1x2xf32>
    %69 = arith.addf %66, %68 : vector<1x2xf32>
    %c0_25 = arith.constant 0 : index
    %c0_26 = arith.constant 0 : index
    %70 = vector.load %arg10[%c0_25, %c0_26] : memref<1x2xf32, #tpu.memory_space<vmem>>, vector<1x2xf32>
    tpu.vector_store %arg10[%c0_25, %c0_26], %69 {strides = array<i32>} : memref<1x2xf32, #tpu.memory_space<vmem>>, vector<1x2xf32>,
    return
  }
}

</mosaic_0001>

<bundles_post_ra>
// kernel: _lambda_.1
= control target key start
LH: loop header
LB: loop body
LE: loop exit
PB: predicated region body
PF: predicated region fallthrough
CT: control target
= control target key end

     0   :  { %s1156_s0 = inlined_call_operand.vmem [shape: f32[1,192], index: 0, kind: input, shape index: {}]   ;;  %s1157_s1 = inlined_call_operand.hbm [shape: f32[8,3], index: 1, kind: input, shape index: {}]   ;;  %s1158_s2 = inlined_call_operand.hbm [shape: f32[16,24], index: 2, kind: input, shape index: {}]   ;;  %s1159_s3 = inlined_call_operand.hbm [shape: f32[8,1], index: 3, kind: input, shape index: {}]   ;;  %s1160_s4 = inlined_call_operand.hbm [shape: f32[16,1], index: 4, kind: input, shape index: {}]   ;;  %s1161_s5 = inlined_call_operand.hbm [shape: f32[186,62], index: 5, kind: input, shape index: {}]   ;;  %s1162_s6 = inlined_call_operand.hbm [shape: f32[56,18], index: 6, kind: input, shape index: {}]   ;;  %s1163_s7 = inlined_call_operand.hbm [shape: f32[16,1], index: 7, kind: input, shape index: {}]   ;;  %s1164_s8 = inlined_call_operand.<no memory space> [shape: f32[1,1], index: 8, kind: input, shape index: {}]   ;;  %s1165_s9 = inlined_call_operand.vmem [shape: f32[18,2], index: 9, kind: input, shape index: {}]   ;;  %s1166_s10 = inlined_call_operand.hbm [shape: f32[1,2], index: 10, kind: output, shape index: {}]  }
   0x1   :  { %v15_v0 = vstv %s1164_s8 }
   0x2   :  { %16 = vst [vmem:[#allocation2] sm:$0x1] %v15_v0 }
   0x3   :  { %17 = vsyncpa [#allocation4], 0 }
   0x4   :  { %18 = vsyncpa [#allocation7], 0 }
   0x5   :  { %19 = vsyncpa [#allocation10], 0 }
   0x6   :  { %20 = vsyncpa [#allocation13], 0 }
   0x7   :  { %21 = vsyncpa [#allocation5], 0  ;;  %s961_s15 = smov [#allocation6]  }
   0x8   :  { %s39_s16 = sshll.u32 %s961_s15, 4  ;;  %s40_s16 = int_to_ptr.vmem [resolvable:$true] %s39_s16 }
   0x9   :  { %s799_s17 = scalar_lea.vmem %s40_s16, 256  ;;  %p804_p1 = scmp.lt.s32.totalorder %s40_s16, %s40_s16 }
   0xa   :  { %p800_p0 = scmp.ne.s32.totalorder %s40_s16, %s799_s17  ;;  %p805_p2 = scmp.lt.s32.totalorder %s799_s17, %s799_s17 }
   0xc   :  { %p806_p3 = por %p805_p2, %p804_p1 }
   0xe   :  { %p807_p4 = pnand %p806_p3, %p800_p0 }
  0x10   :  { %810 = shalt.err (!%p807_p4)
}
  0x11   :  { %s962_s18 = smov 128   ;;  %s963_s19 = smov 8  }
  0x12   :  { %45 = dma.hbm_to_vmem [thread:$0]  %s1158_s2, 256, %s40_s16, [#allocation7], %s962_s18, %s962_s18, %s963_s19  }
  0x13   :  { %s964_s21 = smov [#allocation9]   ;;  %s965_s23 = smov [#allocation12]  }
  0x14   :  { %s61_s22 = sshll.u32 %s964_s21, 4  ;;  %s85_s24 = sshll.u32 %s965_s23, 4  ;;  %s62_s22 = int_to_ptr.vmem [resolvable:$true] %s61_s22  ;;  %s86_s24 = int_to_ptr.vmem [resolvable:$true] %s85_s24 }
  0x15   :  { %s819_s25 = scalar_lea.vmem %s62_s22, 256  ;;  %p824_p6 = scmp.lt.s32.totalorder %s62_s22, %s62_s22 }
  0x16   :  { %p820_p5 = scmp.ne.s32.totalorder %s62_s22, %s819_s25  ;;  %p825_p7 = scmp.lt.s32.totalorder %s819_s25, %s819_s25 }
  0x18   :  { %p826_p8 = por %p825_p7, %p824_p6 }
  0x1a   :  { %p827_p9 = pnand %p826_p8, %p820_p5 }
  0x1c   :  { %830 = shalt.err (!%p827_p9)
}
  0x1d   :  { %67 = dma.hbm_to_vmem [thread:$0]  %s1160_s4, 256, %s62_s22, [#allocation10], %s962_s18, %s962_s18, %s963_s19  }
  0x1e   :  { %s839_s2 = scalar_lea.vmem %s86_s24, 896  ;;  %p844_p11 = scmp.lt.s32.totalorder %s86_s24, %s86_s24 }
  0x1f   :  { %p840_p10 = scmp.ne.s32.totalorder %s86_s24, %s839_s2  ;;  %p845_p12 = scmp.lt.s32.totalorder %s839_s2, %s839_s2 }
  0x21   :  { %p846_p13 = por %p845_p12, %p844_p11 }
  0x23   :  { %p847_p0 = pnand %p846_p13, %p840_p10 }
  0x25   :  { %850 = shalt.err (!%p847_p0)
}
  0x26   :  { %91 = dma.hbm_to_vmem [thread:$0]  %s1162_s6, 896, %s86_s24, [#allocation13], %s962_s18, %s962_s18, %s963_s19  }
  0x27   :  { %s966_s30 = smov [#allocation3]   ;;  %s967_s12 = smov [#allocation8]  }
  0x28   :  { %s30_s11 = sshll.u32 %s966_s30, 4  ;;  %s52_s4 = sshll.u32 %s967_s12, 4  ;;  %s31_s11 = int_to_ptr.vmem [resolvable:$true] %s30_s11  ;;  %s53_s4 = int_to_ptr.vmem [resolvable:$true] %s52_s4 }
  0x29   :  { %s859_s13 = scalar_lea.vmem %s31_s11, 128  ;;  %p864_p2 = scmp.lt.s32.totalorder %s31_s11, %s31_s11 }
  0x2a   :  { %p860_p1 = scmp.ne.s32.totalorder %s31_s11, %s859_s13  ;;  %p865_p3 = scmp.lt.s32.totalorder %s859_s13, %s859_s13 }
  0x2c   :  { %p866_p4 = por %p865_p3, %p864_p2 }
  0x2e   :  { %p867_p5 = pnand %p866_p4, %p860_p1 }
  0x30   :  { %870 = shalt.err (!%p867_p5)
}
  0x31   :  { %33 = dma.hbm_to_vmem [thread:$0]  %s1157_s1, 128, %s31_s11, [#allocation4]  }
  0x32   :  { %s879_s16 = scalar_lea.vmem %s53_s4, 128  ;;  %p884_p7 = scmp.lt.s32.totalorder %s53_s4, %s53_s4 }
  0x33   :  { %p880_p6 = scmp.ne.s32.totalorder %s53_s4, %s879_s16  ;;  %p885_p8 = scmp.lt.s32.totalorder %s879_s16, %s879_s16 }
  0x35   :  { %p886_p9 = por %p885_p8, %p884_p7 }
  0x37   :  { %p887_p10 = pnand %p886_p9, %p880_p6 }
  0x39   :  { %890 = shalt.err (!%p887_p10)
}
  0x3a   :  { %55 = dma.hbm_to_vmem [thread:$0]  %s1159_s3, 128, %s53_s4, [#allocation7]  }
  0x3b   :  { %s968_s8 = smov [#allocation11]   ;;  %s969_s21 = smov [#allocation14]  }
  0x3c   :  { %s73_s20 = sshll.u32 %s968_s8, 4  ;;  %s97_s22 = sshll.u32 %s969_s21, 4  ;;  %s74_s20 = int_to_ptr.vmem [resolvable:$true] %s73_s20  ;;  %s98_s22 = int_to_ptr.vmem [resolvable:$true] %s97_s22 }
  0x3d   :  { %s899_s23 = scalar_lea.vmem %s74_s20, 3072  ;;  %p904_p12 = scmp.lt.s32.totalorder %s74_s20, %s74_s20 }
  0x3e   :  { %p900_p11 = scmp.ne.s32.totalorder %s74_s20, %s899_s23  ;;  %p905_p13 = scmp.lt.s32.totalorder %s899_s23, %s899_s23 }
  0x40   :  { %p906_p0 = por %p905_p13, %p904_p12 }
  0x42   :  { %p907_p1 = pnand %p906_p0, %p900_p11 }
  0x44   :  { %910 = shalt.err (!%p907_p1)
}
  0x45   :  { %79 = dma.hbm_to_vmem [thread:$0]  %s1161_s5, 3072, %s74_s20, [#allocation10], %s962_s18, %s962_s18, %s963_s19  }
  0x46   :  { %s919_s3 = scalar_lea.vmem %s98_s22, 256  ;;  %p924_p3 = scmp.lt.s32.totalorder %s98_s22, %s98_s22 }
  0x47   :  { %p920_p2 = scmp.ne.s32.totalorder %s98_s22, %s919_s3  ;;  %p925_p4 = scmp.lt.s32.totalorder %s919_s3, %s919_s3 }
  0x49   :  { %p926_p5 = por %p925_p4, %p924_p3 }
  0x4b   :  { %p927_p6 = pnand %p926_p5, %p920_p2 }
  0x4d   :  { %930 = shalt.err (!%p927_p6)
}
  0x4e   :  { %103 = dma.hbm_to_vmem [thread:$0]  %s1163_s7, 256, %s98_s22, [#allocation13], %s962_s18, %s962_s18, %s963_s19  }
  0x4f   :  { %951 = dma.done.wait [#allocation4], 128  }
  0x50   :  { %952 = vsyncadd [#allocation4], 4294967168 }
  0x51   :  { %953 = dma.done.wait [#allocation7], 384  }
  0x52   :  { %954 = vsyncadd [#allocation7], 4294966912 }
  0x53   :  { %955 = dma.done.wait [#allocation10], 3328  }
  0x54   :  { %956 = vsyncadd [#allocation10], 4294963968 }
  0x55   :  { %957 = dma.done.wait [#allocation13], 1152  }
  0x56   :  { %958 = vsyncadd [#allocation13], 4294966144  ;;  %v157_v1 = vlaneseq  ;;  %v970_v2 = vmov 0   ;;  %v130_v6 = vld [vmem:[#allocation3] sm:$0xff]  ;;  %s971_s7 = smov 126   ;;  %v972_v10 = vmov 1  }
  0x57   :  { %786 = vset.pattern.permute.xlu0 %v970_v2  ;;  %790 = vset.pattern.permute.xlu1 %v970_v2  ;;  %v1079_v7 = vld [vmem:[%s1156_s0] sm:$0x3]  ;;  %s973_s18 = smov 125   ;;  %v974_v11 = vmov 2   ;;  %s975_s0 = smov 127   ;;  %v147_v13 = vld [vmem:[#allocation11 + $0x78] sm:$0xff] }
  0x58   :  { %v158_v3 = vshrl.u32 %v157_v1, 7  ;;  %199 = vperm.xlu0 %786, %v130_v6   ;;  %v131_v12 = vld [vmem:[#allocation8] sm:$0xff]  ;;  %s976_s19 = smov 124   ;;  %v977_v14 = vmov 0.0   ;;  %v146_v15 = vld [vmem:[#allocation11 + $0x70] sm:$0xff]  ;;  %v144_v17 = vld [vmem:[#allocation11 + $0x60] sm:$0xff] }
  0x59   :  { %280 = vmatprep.subr.mxu0 %v977_v14  ;;  %v145_v16 = vld [vmem:[#allocation11 + $0x68] sm:$0xff]  ;;  %v143_v18 = vld [vmem:[#allocation11 + $0x58] sm:$0xff]  ;;  %v142_v19 = vld [vmem:[#allocation11 + $0x50] sm:$0xff]  ;;  %vm276_vm0 = vcmask 1041408   ;;  %vm169_vm1 = vcmask 1031168   ;;  %vm173_vm2 = vcmask 769024  }
  0x5a   :  { %v1074_v4 = vsub.s32 0, %v158_v3  ;;  %v163_v5 = vsub.s32 1, %v158_v3  ;;  %281 = vmatpush1.msra.mxu0 %v147_v13  ;;  %v141_v20 = vld [vmem:[#allocation11 + $0x48] sm:$0xff]  ;;  %v140_v21 = vld [vmem:[#allocation11 + $0x40] sm:$0xff]  ;;  %v139_v22 = vld [vmem:[#allocation11 + $0x38] sm:$0xff]  ;;  %vm182_vm3 = vcmask 1022976  }
  0x5b   :  { %282 = vmatprep.subr.mxu0 %v977_v14  ;;  %v138_v23 = vld [vmem:[#allocation11 + $0x30] sm:$0xff]  ;;  %v137_v24 = vld [vmem:[#allocation11 + $0x28] sm:$0xff]  ;;  %v136_v25 = vld [vmem:[#allocation11 + $0x20] sm:$0xff]  ;;  %vm192_vm4 = vcmask 1014784   ;;  %vm257_vm5 = vcmask 1039360   ;;  %vm272_vm6 = vcmask 474112  }
  0x5c   :  { %v160_v8 = vrot.slane %v1079_v7, %v1074_v4  ;;  %v164_v9 = vrot.slane %v1079_v7, %v163_v5  ;;  %787 = vset.pattern.permute.xlu0 %v972_v10  ;;  %283 = vmatpush1.msra.mxu0 %v146_v15  ;;  %v135_v26 = vld [vmem:[#allocation11 + $0x18] sm:$0xff]  ;;  %v134_v27 = vld [vmem:[#allocation11 + $0x10] sm:$0xff]  ;;  %v133_v28 = vld [vmem:[#allocation11 + $0x8] sm:$0xff]  ;;  %vm389_vm7 = vcmask 195584   ;;  %vm375_vm8 = vcmask 236544  }
  0x5d   :  { %213 = vperm.xlu0 %787, %v130_v6   ;;  %284 = vmatprep.subr.mxu0 %v977_v14  ;;  %v132_v29 = vld [vmem:[#allocation11] sm:$0xff]  ;;  %v155_v30 = vld [vmem:[#allocation11 + $0xb8] sm:$0x3]  ;;  %v154_v31 = vld [vmem:[#allocation11 + $0xb0] sm:$0xff]  ;;  %vm489_vm9 = vcmask 457728   ;;  %vm978_vm10 = vmmov 0  }
  0x5e   :  { %165 = vrot.lane.b32.xlu1 %v160_v8, %s971_s7  ;;  %285 = vmatpush1.msra.mxu0 %v145_v16  ;;  %v153_v43 = vld [vmem:[#allocation11 + $0xa8] sm:$0xff]  ;;  %v152_v44 = vld [vmem:[#allocation11 + $0xa0] sm:$0xff]  ;;  %v151_v54 = vld [vmem:[#allocation11 + $0x98] sm:$0xff]  ;;  %vm587_vm11 = vcmask 146432   ;;  %vm686_vm12 = vcmask 8192  }
  0x5f   :  { %286 = vmatprep.subr.mxu0 %v977_v14  ;;  %v150_v60 = vld [vmem:[#allocation11 + $0x90] sm:$0xff]  ;;  %v149_v1 = vld [vmem:[#allocation11 + $0x88] sm:$0xff]  ;;  %v148_v5 = vld [vmem:[#allocation11 + $0x80] sm:$0xff] }
  0x60   :  { %287 = vmatpush1.msra.mxu0 %v144_v17 }
  0x61   :  { %180 = vrot.lane.b32.xlu0 %v164_v9, %s973_s18  ;;  %288 = vmatprep.subr.mxu0 %v977_v14 }
  0x62   :  { %167 = vrot.lane.b32.xlu1 %v164_v9, %s971_s7  ;;  %788 = vset.pattern.permute.xlu0 %v974_v11 }
  0x63   :  { %289 = vmatpush1.msra.mxu0 %v143_v18 }
  0x64   :  { %290 = vmatprep.subr.mxu0 %v977_v14 }
  0x65   :  { %229 = vperm.xlu0 %788, %v130_v6   ;;  %291 = vmatpush1.msra.mxu0 %v142_v19 }
  0x66   :  { %178 = vrot.lane.b32.xlu1 %v160_v8, %s973_s18  ;;  %292 = vmatprep.subr.mxu0 %v977_v14 }
  0x67   :  { %293 = vmatpush1.msra.mxu0 %v141_v20 }
  0x68   :  { %294 = vmatprep.subr.mxu0 %v977_v14 }
  0x69   :  { %789 = vset.pattern.permute.xlu0 %v970_v2  ;;  %295 = vmatpush1.msra.mxu0 %v140_v21 }
  0x6a   :  { %175 = vrot.lane.b32.xlu1 %v160_v8, %s975_s0  ;;  %246 = vperm.xlu0 %789, %v131_v12  }
  0x6b   :  { %296 = vmatprep.subr.mxu0 %v977_v14 }
  0x6c   :  { %297 = vmatpush1.msra.mxu0 %v139_v22 }
  0x6d   :  { %298 = vmatprep.subr.mxu0 %v977_v14 }
  0x6e   :  { %188 = vrot.lane.b32.xlu1 %v160_v8, %s976_s19  ;;  %299 = vmatpush1.msra.mxu0 %v138_v23 }
  0x6f   :  { %300 = vmatprep.subr.mxu0 %v977_v14 }
  0x70   :  { %301 = vmatpush1.msra.mxu0 %v137_v24  ;;  %v351_v24 = vld [vmem:[#allocation6] sm:$0xff] }
  0x71   :  { %302 = vmatprep.subr.mxu0 %v977_v14  ;;  %738 = vmatprep.mubr.msk.f32.mxu1 %vm389_vm7, %v351_v24 }
  0x72   :  { %190 = vrot.lane.b32.xlu1 %v164_v9, %s976_s19  ;;  %303 = vmatpush1.msra.mxu0 %v136_v25 }
  0x73   :  { %304 = vmatprep.subr.mxu0 %v977_v14 }
  0x74   :  { %305 = vmatpush1.msra.mxu0 %v135_v26 }
  0x75   :  { %306 = vmatprep.subr.mxu0 %v977_v14 }
  0x76   :  { %307 = vmatpush1.msra.mxu0 %v134_v27  ;;  %v353_v27 = vld [vmem:[#allocation9] sm:$0xff] }
  0x77   :  { %308 = vmatprep.subr.mxu0 %v977_v14 }
  0x78   :  { %309 = vmatpush1.msra.mxu0 %v133_v28  ;;  %v354_v28 = vld [vmem:[#allocation9 + $0x8] sm:$0xff] }
  0x79   :  { %310 = vmatprep.subr.mxu0 %v977_v14 }
  0x7a   :  { %311 = vmatpush1.msra.mxu0 %v132_v29 }
  0x7b   :  { %328 = vmatprep.subr.mxu0 %v977_v14 }
  0x7c   :  { %706 = vmatpush2.msk.msra.mxu0 %vm276_vm0, %v155_v30 }
  0x7d   :  { %330 = vmatprep.subr.mxu0 %v977_v14 }
  0x7e   :  { %331 = vmatpush2.msra.mxu0 %v154_v31 }
  0x7f   :  { %332 = vmatprep.subr.mxu0 %v977_v14 }
  0x80   :  { %333 = vmatpush2.msra.mxu0 %v153_v43 }
  0x81   :  { %334 = vmatprep.subr.mxu0 %v977_v14 }
  0x82   :  { %335 = vmatpush2.msra.mxu0 %v152_v44 }
  0x83   :  { %336 = vmatprep.subr.mxu0 %v977_v14 }
  0x84   :  { %337 = vmatpush2.msra.mxu0 %v151_v54 }
  0x85   :  { %338 = vmatprep.subr.mxu0 %v977_v14 }
  0x86   :  { %339 = vmatpush2.msra.mxu0 %v150_v60  ;;  %v598_v60 = vld [vmem:[%s1165_s9 + $0x8] sm:$0xff] }
  0x87   :  { %340 = vmatprep.subr.mxu0 %v977_v14 }
  0x88   :  { %341 = vmatpush2.msra.mxu0 %v149_v1 }
  0x89   :  { %342 = vmatprep.subr.mxu0 %v977_v14 }
  0x8a   :  { %343 = vmatpush2.msra.mxu0 %v148_v5 }
  0xd0   :  { %v166_v32 = vpop.permute.xlu1 %165 }
  0xd3   :  { %v200_v34 = vpop.permute.xlu0 %199 }
  0xd4   :  { %v168_v33 = vpop.permute.xlu1 %167 }
  0xd5   :  { %v170_v38 = vsel %vm169_vm1, %v166_v32, %v168_v33  ;;  %v209_v50 = vrot.slane %v168_v33, %v1074_v4 }
  0xd6   :  { %v174_v39 = vsel %vm173_vm2, %v1079_v7, %v170_v38  ;;  %v358_v38 = vld [vmem:[#allocation12 + $0x18] sm:$0xff] }
  0xd7   :  { %v205_v46 = vrot.slane %v174_v39, %v1074_v4  ;;  %v211_v61 = vmul.f32 %v209_v50, %v200_v34  ;;  %v357_v39 = vld [vmem:[#allocation12 + $0x10] sm:$0xff]  ;;  %v600_v50 = vld [vmem:[#allocation2] sm:$0x1] }
  0xd8   :  { %v179_v35 = vpop.permute.xlu1 %178  ;;  %v214_v36 = vpop.permute.xlu0 %213 }
  0xd9   :  { %v210_v57 = vmul.f32 %v205_v46, %v200_v34  ;;  %v352_v34 = vld [vmem:[#allocation6 + $0x8] sm:$0xff] }
  0xdc   :  { %v176_v37 = vpop.permute.xlu1 %175  ;;  %v181_v40 = vpop.permute.xlu0 %180 }
  0xdd   :  { %v183_v42 = vsel %vm182_vm3, %v179_v35, %v181_v40  ;;  %v223_v48 = vrot.slane %v181_v40, %v1074_v4  ;;  %v361_v35 = vld [vmem:[#allocation12 + $0x30] sm:$0xff]  ;;  %v356_v40 = vld [vmem:[#allocation12 + $0x8] sm:$0xff] }
  0xde   :  { %v186_v45 = vsel %vm173_vm2, %v176_v37, %v183_v42  ;;  %v359_v37 = vld [vmem:[#allocation12 + $0x20] sm:$0xff] }
  0xdf   :  { %v219_v47 = vrot.slane %v186_v45, %v1074_v4  ;;  %v225_v58 = vmul.f32 %v223_v48, %v214_v36  ;;  %v574_v48 = vld [vmem:[#allocation14 + $0x8] sm:$0xff] }
  0xe0   :  { %v189_v41 = vpop.permute.xlu1 %188  ;;  %v230_v56 = vpop.permute.xlu0 %229 }
  0xe1   :  { %v224_v51 = vmul.f32 %v219_v47, %v214_v36  ;;  %v227_v2 = vadd.f32 %v225_v58, %v211_v61  ;;  %v360_v36 = vld [vmem:[#allocation12 + $0x28] sm:$0xff] }
  0xe2   :  { %v597_v61 = vld [vmem:[%s1165_s9] sm:$0xff] }
  0xe3   :  { %v226_v0 = vadd.f32 %v224_v51, %v210_v57 }
  0xe4   :  { %v191_v49 = vpop.permute.xlu1 %190 }
  0xe5   :  { %v193_v52 = vsel %vm192_vm4, %v189_v41, %v191_v49  ;;  %v239_v53 = vrot.slane %v191_v49, %v1074_v4  ;;  %v247_v6 = vpop.permute.xlu0 %246  ;;  %v355_v41 = vld [vmem:[#allocation12] sm:$0xff]  ;;  %v573_v49 = vld [vmem:[#allocation14] sm:$0xff] }
  0xe6   :  { %v196_v55 = vsel %vm173_vm2, %v166_v32, %v193_v52 }
  0xe7   :  { %v235_v59 = vrot.slane %v196_v55, %v1074_v4  ;;  %v241_v63 = vmul.f32 %v239_v53, %v230_v56 }
  0xe9   :  { %v240_v62 = vmul.f32 %v235_v59, %v230_v56  ;;  %v243_v7 = vadd.f32 %v241_v63, %v227_v2  ;;  %v599_v59 = vld [vmem:[%s1165_s9 + $0x10] sm:$0x3]  ;;  %s979_s9 = smov [#allocation15]  }
  0xea   :  { %s694_s4 = sshll.u32 %s979_s9, 4  ;;  %s695_s4 = int_to_ptr.vmem [resolvable:$true] %s694_s4 }
  0xeb   :  { %v242_v3 = vadd.f32 %v240_v62, %v226_v0  ;;  %v250_v9 = vadd.f32 %v247_v6, %v243_v7  ;;  %s931_s13 = scalar_lea.vmem %s695_s4, 16  ;;  %s935_s14 = scalar_lea.vmem %s695_s4, 32 }
  0xec   :  { %p932_p7 = scmp.ne.s32.totalorder %s695_s4, %s931_s13  ;;  %p936_p8 = scmp.lt.s32.totalorder %s695_s4, %s695_s4 }
  0xed   :  { %v249_v8 = vadd.f32 %v247_v6, %v242_v3  ;;  %p937_p9 = scmp.lt.s32.totalorder %s935_s14, %s931_s13 }
  0xef   :  { %263 = vrot.lane.b32.xlu0 %v249_v8, %s971_s7  ;;  %253 = vrot.lane.b32.xlu1 %v249_v8, %s975_s0  ;;  %p938_p10 = por %p937_p9, %p936_p8 }
  0xf1   :  { %p939_p11 = pnand %p938_p10, %p932_p7 }
  0xf3   :  { %255 = vrot.lane.b32.xlu1 %v250_v9, %s975_s0 }
  0xf7   :  { %265 = vrot.lane.b32.xlu1 %v250_v9, %s971_s7 }
 0x161   :  { %v254_v10 = vpop.permute.xlu1 %253  ;;  %v264_v15 = vpop.permute.xlu0 %263 }
 0x165   :  { %v256_v11 = vpop.permute.xlu1 %255 }
 0x166   :  { %v258_v12 = vsel %vm257_vm5, %v254_v10, %v256_v11  ;;  %v262_v13 = vmax.f32 %v250_v9, %v256_v11 }
 0x167   :  { %v261_v16 = vmax.f32 %v249_v8, %v258_v12 }
 0x169   :  { %v266_v17 = vpop.permute.xlu1 %265 }
 0x16a   :  { %v267_v18 = vsel %vm169_vm1, %v264_v15, %v266_v17  ;;  %v271_v19 = vmax.f32 %v262_v13, %v266_v17 }
 0x16b   :  { %v270_v20 = vmax.f32 %v261_v16, %v267_v18 }
 0x16c   :  { %707 = vmatprep.mubr.msk.f32.mxu0 %vm272_vm6, %v271_v19 }
 0x16d   :  { %345 = vmatmul.mubr.f32.vlgmr.msra.gmra.mxu0 %v270_v20 }
 0x22d   :  { %v346_v21 = vpop.f32.mrf.mxu0 }
 0x22e   :  { %v350_v22 = vmax.f32 %v346_v21, 0.0 }
 0x22f   :  { %v348_v23 = vpop.f32.mrf.mxu0 }
 0x230   :  { %363 = vrot.lane.b32.xlu1 %v350_v22, %s975_s0  ;;  %366 = vrot.lane.b32.xlu0 %v350_v22, %s971_s7 }
 0x2a2   :  { %v364_v25 = vpop.permute.xlu1 %363  ;;  %v367_v26 = vpop.permute.xlu0 %366 }
 0x2a3   :  { %369 = vrot.lane.b32.xlu1 %v364_v25, %s971_s7  ;;  %371 = vrot.lane.b32.xlu0 %v367_v26, %s971_s7  ;;  %v376_v33 = vsel %vm375_vm8, %v350_v22, %v367_v26 }
 0x2a7   :  { %381 = vperm.xlu0 %789, %v353_v27   ;;  %386 = vperm.xlu1 %790, %v354_v28  }
 0x315   :  { %v370_v29 = vpop.permute.xlu1 %369  ;;  %v372_v30 = vpop.permute.xlu0 %371 }
 0x316   :  { %v378_v31 = vsel %vm375_vm8, %v367_v26, %v372_v30  ;;  %v377_v32 = vsel %vm375_vm8, %v364_v25, %v370_v29 }
 0x317   :  { %732 = vmatprep.subr.mxu1 %v378_v31 }
 0x318   :  { %733 = vmatpush3.msra.mxu1 %v378_v31 }
 0x319   :  { %734 = vmatprep.subr.mxu1 %v377_v32 }
 0x31a   :  { %735 = vmatpush3.msra.mxu1 %v377_v32 }
 0x31b   :  { %736 = vmatprep.subr.mxu1 %v376_v33 }
 0x31c   :  { %737 = vmatpush3.msra.mxu1 %v376_v33 }
 0x31d   :  { %739 = vmatmul.mubr.msk.f32.vlgmr.msra.gmra.mxu1 %vm389_vm7, %v352_v34  ;;  %741 = vmatprep.subr.mxu1 %v361_v35 }
 0x31e   :  { %742 = vmatpush3.msra.mxu1 %v361_v35 }
 0x31f   :  { %743 = vmatprep.subr.mxu1 %v360_v36 }
 0x320   :  { %744 = vmatpush3.msra.mxu1 %v360_v36 }
 0x321   :  { %745 = vmatprep.subr.mxu1 %v359_v37 }
 0x322   :  { %746 = vmatpush3.msra.mxu1 %v359_v37  ;;  %v387_v42 = vpop.permute.xlu1 %386  ;;  %v382_v45 = vpop.permute.xlu0 %381 }
 0x323   :  { %747 = vmatprep.subr.mxu1 %v358_v38 }
 0x324   :  { %748 = vmatpush3.msra.mxu1 %v358_v38 }
 0x325   :  { %749 = vmatprep.subr.mxu1 %v357_v39 }
 0x326   :  { %750 = vmatpush3.msra.mxu1 %v357_v39 }
 0x327   :  { %751 = vmatprep.subr.mxu1 %v356_v40 }
 0x328   :  { %752 = vmatpush3.msra.mxu1 %v356_v40 }
 0x329   :  { %753 = vmatprep.subr.mxu1 %v355_v41 }
 0x32a   :  { %754 = vmatpush3.msra.mxu1 %v355_v41 }
 0x32b   :  { %758 = vmatprep.subr.mxu1 %v977_v14 }
 0x3dd   :  { %v740_v43 = vpop.f32.mrf.mxu1 }
 0x3de   :  { %v468_v44 = vadd.f32 %v740_v43, %v387_v42 }
 0x3df   :  { %v462_v46 = vpop.f32.mrf.mxu1 }
 0x3e0   :  { %v463_v47 = vadd.f32 %v462_v46, %v382_v45  ;;  %475 = vrot.lane.b32.xlu1 %v468_v44, %s975_s0 }
 0x3e2   :  { %473 = vrot.lane.b32.xlu0 %v463_v47, %s975_s0 }
 0x3e4   :  { %483 = vrot.lane.b32.xlu1 %v468_v44, %s971_s7 }
 0x3e6   :  { %481 = vrot.lane.b32.xlu0 %v463_v47, %s971_s7 }
 0x3e8   :  { %582 = vperm.xlu1 %790, %v574_v48  }
 0x3ea   :  { %577 = vperm.xlu0 %789, %v573_v49  }
 0x3ee   :  { %603 = vperm.xlu0 %789, %v600_v50  }
 0x452   :  { %v476_v51 = vpop.permute.xlu1 %475 }
 0x453   :  { %v480_v55 = vmax.f32 %v468_v44, %v476_v51 }
 0x454   :  { %v474_v52 = vpop.permute.xlu0 %473 }
 0x455   :  { %v479_v53 = vmax.f32 %v463_v47, %v474_v52 }
 0x456   :  { %v484_v54 = vpop.permute.xlu1 %483 }
 0x457   :  { %v488_v58 = vmax.f32 %v480_v55, %v484_v54 }
 0x458   :  { %v482_v56 = vpop.permute.xlu0 %481 }
 0x459   :  { %v487_v57 = vmax.f32 %v479_v53, %v482_v56 }
 0x45b   :  { %755 = vmatprep.mubr.msk.f32.mxu1 %vm489_vm9, %v487_v57 }
 0x45c   :  { %756 = vmatmul.mubr.msk.f32.vlgmr.msra.gmra.mxu1 %vm489_vm9, %v488_v58 }
 0x45d   :  { %759 = vmatpush3.msk.msra.mxu1 %vm276_vm0, %v599_v59  ;;  %764 = vmatprep.mubr.msk.f32.mxu1 %vm978_vm10, %v977_v14 }
 0x45e   :  { %760 = vmatprep.subr.mxu1 %v977_v14 }
 0x45f   :  { %761 = vmatpush3.msra.mxu1 %v598_v60 }
 0x460   :  { %762 = vmatprep.subr.mxu1 %v977_v14 }
 0x461   :  { %763 = vmatpush3.msra.mxu1 %v597_v61 }
 0x463   :  { %v583_v0 = vpop.permute.xlu1 %582 }
 0x465   :  { %v578_v5 = vpop.permute.xlu0 %577 }
 0x469   :  { %v604_v14 = vpop.permute.xlu0 %603 }
 0x46a   :  { %v609_v17 = vrot.slane %v604_v14, %v1074_v4 }
 0x51c   :  { %v757_v62 = vpop.f32.mrf.mxu1 }
 0x51d   :  { %v572_v63 = vmax.f32 %v757_v62, 0.0 }
 0x51e   :  { %v562_v1 = vpop.f32.mrf.mxu1 }
 0x51f   :  { %v586_v2 = vmul.f32 %v583_v0, %v572_v63  ;;  %v571_v3 = vmax.f32 %v562_v1, 0.0 }
 0x521   :  { %v585_v6 = vmul.f32 %v578_v5, %v571_v3  ;;  %v589_v7 = vsel %vm587_vm11, %v586_v2, 0.0 }
 0x523   :  { %v588_v8 = vsel %vm587_vm11, %v585_v6, 0.0 }
 0x524   :  { %v590_v9 = vadd.f32 %v589_v7, %v588_v8 }
 0x526   :  { %v591_v10 = vrot.slane %v590_v9, 4 }
 0x528   :  { %v592_v11 = vadd.f32 %v591_v10, %v590_v9 }
 0x52a   :  { %v593_v12 = vrot.slane %v592_v11, 2 }
 0x52c   :  { %v594_v13 = vadd.f32 %v593_v12, %v592_v11 }
 0x52e   :  { %v595_v15 = vrot.slane %v594_v13, 1 }
 0x530   :  { %v596_v16 = vadd.f32 %v595_v15, %v594_v13 }
 0x532   :  { %765 = vmatmul.mubr.msk.f32.vlgmr.msra.gmra.mxu1 %vm587_vm11, %v596_v16 }
 0x5f2   :  { %v682_v18 = vpop.f32.mrf.mxu1 }
 0x5f3   :  { %v683_v19 = vadd.f32 %v682_v18, %v609_v17 }
 0x5f4   :  { %v766_v20 = vpop.f32.mrf.mxu1 }
 0x5f5   :  { %687 = vst.msk [vmem:[#allocation15] sm:$0x1] %vm686_vm12, %v683_v19 }
 0x5f6   :  { %942 = shalt.err (!%p939_p11)
}
 0x5f7   :  { %697 = dma.vmem_to_hbm [thread:$0]  %s695_s4, 16, %s1166_s10, [#allocation5]  }
 0x5f8   :  { %959 = dma.done.wait [#allocation5], 16  }
 0x5f9   :  { %960 = vsyncadd [#allocation5], 4294967280 }
 0x5fa   :  { %701 = vsyncpa [#allocation4], 1 }
 0x5fb   :  { %702 = vsyncpa [#allocation7], 1 }
 0x5fc   :  { %703 = vsyncpa [#allocation10], 1 }
 0x5fd   :  { %704 = vsyncpa [#allocation13], 1 }
 0x5fe   :  { %705 = vsyncpa [#allocation5], 1 }

</bundles_post_ra>
